<compile_context>
chip_gen: v6e
topology: v6e:2x2x1
jax: 0.10.0
libtpu: 0.0.40
codegen_flags: <defaults>
</compile_context>

<pallas_src>
import functools

import numpy as np
import jax
import jax.numpy as jnp
from jax import lax
from jax.experimental import pallas as pl
from jax.experimental.pallas import tpu as pltpu

LANE = 128      # vreg lane width
SUB = 8         # vreg sublane count

H_CLIN = 100    # clinical hidden width (original)
H_MOL = 160     # molecular hidden width
H_FIN = 350     # final hidden width (original)
H_CLIN_P = 128  # clinical hidden padded to a full lane tile
H_FIN_P = 384   # final hidden padded to a multiple of 128

TILE_B = 8      # patients per grid step (multiple of 8; raise for large batches)


def _round_up(x, m):
    return (x + m - 1) // m * m


def _build_layout(dc):
    """Lane-aligned packing layout for all small (bias / folded-BN / rank-1) vectors."""
    segs = [
        ("bn1_s", dc), ("bn1_b", dc),
        ("b1c", H_CLIN_P), ("b2c", H_CLIN_P),
        ("b1m", H_MOL), ("b2m", H_MOL),
        ("bn2c_s", H_CLIN_P), ("bn2c_b", H_CLIN_P),
        ("bn2m_s", H_MOL), ("bn2m_b", H_MOL),
        ("bf1", H_FIN_P), ("wf2", H_FIN_P), ("bf2", 1),
    ]
    layout, off = {}, 0
    for name, width in segs:
        layout[name] = (off, width)
        off = _round_up(off + width, LANE)     # every segment starts 128-lane aligned
    return layout, off


# ----------------------------------------------------------------------------- kernel
def combined_survival_kernel(
    xc_ref, xm_ref, vec_ref,
    w1c_ref, w12m_ref, wcf_ref, wf1m_ref,
    out_ref,
    *, layout, tile_b, n_mut, dm_p,
):
    f32 = jnp.float32
    bf16 = jnp.bfloat16

    def seg(name):
        off, width = layout[name]
        return vec_ref[:, off:off + width]       # static slice of packed vector, (1, w) f32

    # ---- Clinical branch: BN1d(Dc) -> Linear(Dc,100p) -> ReLU -> [Dropout=id] -> Linear(100p,100p)
    c = xc_ref[...] * seg("bn1_s") + seg("bn1_b")                                        # (tB, Dc) f32
    h = jnp.dot(c.astype(bf16), w1c_ref[...], preferred_element_type=f32) + seg("b1c")   # (tB, 128)
    h = jnp.maximum(h, 0.0)
    clin = (jnp.dot(h.astype(bf16), wcf_ref[:, :H_CLIN_P], preferred_element_type=f32)
            + seg("b2c"))                                                                 # (tB, 128)

    # ---- Molecular branch: Linear(Dm,160) -> Tanh -> [Dropout=id] -> Linear(160,160)
    # xm arrives bf16 from the wrapper (matmul-only input); tanh runs in f32, output
    # is downcast to bf16 so only the narrow copy stays live into the next dot.
    hm = jnp.tanh(jnp.dot(xm_ref[...], w12m_ref[:dm_p, :], preferred_element_type=f32)
                  + seg("b1m")).astype(bf16)                                              # (tB*M, 160) bf16
    mm = (jnp.dot(hm, w12m_ref[dm_p:, :], preferred_element_type=f32)
          + seg("b2m"))                                                                   # (tB*M, 160) f32

    # mean pool over mutations: in-kernel (tB, tB*M) selection matmul built from iota.
    # Pool entries are exactly 1.0 (representable in bf16); 1/n_mut applied in f32 after
    # the dot so mm is the only bf16-rounded factor.
    bm = tile_b * n_mut
    row = lax.broadcasted_iota(jnp.int32, (tile_b, bm), 0)
    col = lax.broadcasted_iota(jnp.int32, (tile_b, bm), 1)
    lo = row * n_mut
    pool = jnp.where((col >= lo) & (col < lo + n_mut), 1.0, 0.0).astype(bf16)
    mol = (jnp.dot(pool, mm.astype(bf16), preferred_element_type=f32)
           * (1.0 / n_mut))                                                               # (tB, 160) f32

    # ---- Final layers: BN1d(260 split 100|160) -> Linear(260,350p) -> Tanh -> Linear(350p,1)
    zc = clin * seg("bn2c_s") + seg("bn2c_b")
    zm = mol * seg("bn2m_s") + seg("bn2m_b")
    z = (jnp.dot(zc.astype(bf16), wcf_ref[:, H_CLIN_P:], preferred_element_type=f32)
         + jnp.dot(zm.astype(bf16), wf1m_ref[...], preferred_element_type=f32)
         + seg("bf1"))
    t = jnp.tanh(z)                                                                        # (tB, 384) f32

    # rank-1 output projection on the VPU/XLU instead of an N=1 MXU matmul
    risk = jnp.sum(t * seg("wf2"), axis=1, keepdims=True) + seg("bf2")                     # (tB, 1)
    out_ref[...] = jnp.broadcast_to(risk, out_ref.shape)                                   # lane-dense store


# ----------------------------------------------------------------------------- wrapper
def combined_survival_forward(xc, xm, kp, *, tile_b=TILE_B):
    """xc: (B, Dc) f32; xm: (B, M, Dm) f32; kp: packed params from pack_params()."""
    B, M, Dm = xm.shape
    Dc = xc.shape[1]
    dm_p = kp["dm_p"]
    Bp = _round_up(B, tile_b)                    # pad batch rows to a whole number of tiles
    n_tiles = Bp // tile_b

    xc_p = jnp.pad(xc.astype(jnp.float32), ((0, Bp - B), (0, 0)))
    xm_p = jnp.pad(
        xm.astype(jnp.float32).reshape(B * M, Dm),
        ((0, (Bp - B) * M), (0, dm_p - Dm)),
    ).astype(jnp.bfloat16)                       # matmul-only input -> precast to bf16

    kernel = functools.partial(
        combined_survival_kernel,
        layout=kp["layout"], tile_b=tile_b, n_mut=M, dm_p=dm_p)

    # Batch grid: per-step xc/xm/out tiles indexed on i; all weight / packed-vector
    # operands use a constant block index so they are DMA'd once and stay VMEM-resident
    # across grid steps.  "parallel" shards the batch axis across v7x's two TensorCores.
    grid_spec = pltpu.PrefetchScalarGridSpec(
        num_scalar_prefetch=0,
        grid=(n_tiles,),
        in_specs=[
            pl.BlockSpec((tile_b, Dc), lambda i: (i, 0)),            # xc tile      (f32)
            pl.BlockSpec((tile_b * M, dm_p), lambda i: (i, 0)),      # xm tile      (bf16)
            pl.BlockSpec(kp["vec"].shape, lambda i: (0, 0)),         # packed vecs  (f32, resident)
            pl.BlockSpec(kp["w1c"].shape, lambda i: (0, 0)),         # (Dc,128)     (bf16, resident)
            pl.BlockSpec(kp["w12m"].shape, lambda i: (0, 0)),        # (Dm_p+160,160)
            pl.BlockSpec(kp["wcf"].shape, lambda i: (0, 0)),         # (128,512) = [w2c|wf1c]
            pl.BlockSpec(kp["wf1m"].shape, lambda i: (0, 0)),        # (160,384)
        ],
        out_specs=pl.BlockSpec((tile_b, LANE), lambda i: (i, 0)),
    )

    out = pl.pallas_call(
        kernel,
        out_shape=jax.ShapeDtypeStruct((Bp, LANE), jnp.float32),
        grid_spec=grid_spec,
        compiler_params=pltpu.CompilerParams(
            dimension_semantics=("parallel",)),
    )(xc_p, xm_p, kp["vec"], kp["w1c"], kp["w12m"], kp["wcf"], kp["wf1m"])
    return out[:B, :1]


# ----------------------------------------------------------------------------- params
def _fold_bn(gamma, beta, mean, var, eps=1e-5):
    scale = gamma / jnp.sqrt(var + eps)
    shift = beta - mean * scale
    return scale.astype(jnp.float32), shift.astype(jnp.float32)


def make_params(key, Dc, Dm):
    """Original-shape f32 parameters (eval-mode BN folded).  Dropout is identity at eval."""
    ks = jax.random.split(key, 24)

    def w(k, i, o, s=0.1):
        return (s * jax.random.normal(k, (i, o))).astype(jnp.float32)

    def b(k, o, s=0.05):
        return (s * jax.random.normal(k, (o,))).astype(jnp.float32)

    bn1_s, bn1_b = _fold_bn(
        1.0 + 0.1 * jax.random.normal(ks[0], (Dc,)),
        0.1 * jax.random.normal(ks[1], (Dc,)),
        0.1 * jax.random.normal(ks[2], (Dc,)),
        1.0 + 0.1 * jax.random.uniform(ks[3], (Dc,)),
    )
    bn2_s, bn2_b = _fold_bn(
        1.0 + 0.1 * jax.random.normal(ks[4], (260,)),
        0.1 * jax.random.normal(ks[5], (260,)),
        0.1 * jax.random.normal(ks[6], (260,)),
        1.0 + 0.1 * jax.random.uniform(ks[7], (260,)),
    )
    wf1 = w(ks[8], 260, H_FIN)

    return dict(
        bn1_s=bn1_s, bn1_b=bn1_b,
        w1c=w(ks[9], Dc, H_CLIN), b1c=b(ks[10], H_CLIN),
        w2c=w(ks[11], H_CLIN, H_CLIN), b2c=b(ks[12], H_CLIN),
        w1m=w(ks[13], Dm, H_MOL), b1m=b(ks[14], H_MOL),
        w2m=w(ks[15], H_MOL, H_MOL), b2m=b(ks[16], H_MOL),
        bn2c_s=bn2_s[:H_CLIN], bn2c_b=bn2_b[:H_CLIN],
        bn2m_s=bn2_s[H_CLIN:], bn2m_b=bn2_b[H_CLIN:],
        wf1c=wf1[:H_CLIN, :], wf1m=wf1[H_CLIN:, :],
        bf1=b(ks[17], H_FIN),
        wf2=w(ks[18], H_FIN, 1), bf2=b(ks[19], 1),
    )


def pack_params(p, Dc, Dm):
    """Pad weights to lane/sublane-friendly shapes (bf16), merge operands that share a
    contraction/row dim, and pack all small vectors into one lane-aligned f32 operand."""
    f32, bf16 = jnp.float32, jnp.bfloat16
    layout, total = _build_layout(Dc)
    dm_p = _round_up(Dm, SUB)

    vec = jnp.zeros((total,), f32)
    for name in ("bn1_s", "bn1_b", "b1c", "b2c", "b1m", "b2m",
                 "bn2c_s", "bn2c_b", "bn2m_s", "bn2m_b", "bf1", "wf2", "bf2"):
        off, _ = layout[name]
        val = jnp.ravel(p[name].astype(f32))
        vec = vec.at[off:off + val.shape[0]].set(val)

    def padw(wm, rows, cols):
        r, c = wm.shape
        return jnp.pad(wm, ((0, rows - r), (0, cols - c))).astype(bf16)

    w1c = padw(p["w1c"], Dc, H_CLIN_P)            # (Dc, 128)
    w1m = padw(p["w1m"], dm_p, H_MOL)             # (Dm_p, 160)
    w2m = padw(p["w2m"], H_MOL, H_MOL)            # (160, 160)
    w2c = padw(p["w2c"], H_CLIN_P, H_CLIN_P)      # (128, 128)
    wf1c = padw(p["wf1c"], H_CLIN_P, H_FIN_P)     # (128, 384)
    wf1m = padw(p["wf1m"], H_MOL, H_FIN_P)        # (160, 384)

    return dict(
        layout=layout,
        dm_p=dm_p,
        vec=vec[None, :],                                    # (1, total) f32
        w1c=w1c,                                             # (Dc, 128)       bf16
        w12m=jnp.concatenate([w1m, w2m], axis=0),            # (Dm_p+160, 160) bf16  [w1m; w2m]
        wcf=jnp.concatenate([w2c, wf1c], axis=1),            # (128, 512)      bf16  [w2c | wf1c]
        wf1m=wf1m,                                           # (160, 384)      bf16
    )


# ----------------------------------------------------------------------------- references
def reference_forward_mirrored(xc, xm, p):
    """Plain-JAX reference with the same bf16 weight/activation quantization as the kernel."""
    f32, bf16 = jnp.float32, jnp.bfloat16
    dot = lambda x, wm: jnp.dot(x.astype(bf16), wm.astype(bf16), preferred_element_type=f32)
    B, M, Dm = xm.shape
    c = xc * p["bn1_s"] + p["bn1_b"]
    h = jnp.maximum(dot(c, p["w1c"]) + p["b1c"], 0.0)
    clin = dot(h, p["w2c"]) + p["b2c"]
    hm = jnp.tanh(dot(xm.reshape(B * M, Dm), p["w1m"]) + p["b1m"])
    mm = dot(hm, p["w2m"]) + p["b2m"]
    row = lax.broadcasted_iota(jnp.int32, (B, B * M), 0)
    col = lax.broadcasted_iota(jnp.int32, (B, B * M), 1)
    pool = jnp.where((col >= row * M) & (col < row * M + M), 1.0, 0.0)
    mol = jnp.dot(pool.astype(bf16), mm.astype(bf16), preferred_element_type=f32) * (1.0 / M)
    zc = clin * p["bn2c_s"] + p["bn2c_b"]
    zm = mol * p["bn2m_s"] + p["bn2m_b"]
    z = dot(zc, p["wf1c"]) + dot(zm, p["wf1m"]) + p["bf1"]
    t = jnp.tanh(z)
    return jnp.sum(t * p["wf2"][:, 0][None, :], axis=1, keepdims=True) + p["bf2"]


def reference_forward_f32(xc, xm, p):
    """Original-module (eval-mode) semantics in full f32."""
    hp = jax.lax.Precision.HIGHEST
    c = xc * p["bn1_s"] + p["bn1_b"]
    h = jnp.maximum(jnp.dot(c, p["w1c"], precision=hp) + p["b1c"], 0.0)
    clin = jnp.dot(h, p["w2c"], precision=hp) + p["b2c"]
    hm = jnp.tanh(jnp.dot(xm, p["w1m"], precision=hp) + p["b1m"])
    mm = jnp.dot(hm, p["w2m"], precision=hp) + p["b2m"]
    mol = mm.mean(axis=1)
    zc = clin * p["bn2c_s"] + p["bn2c_b"]
    zm = mol * p["bn2m_s"] + p["bn2m_b"]
    z = jnp.dot(zc, p["wf1c"], precision=hp) + jnp.dot(zm, p["wf1m"], precision=hp) + p["bf1"]
    return jnp.dot(jnp.tanh(z), p["wf2"], precision=hp) + p["bf2"]


# ----------------------------------------------------------------------------- main
if __name__ == "__main__":
    B, Dc, M, Dm = 4, 16, 17, 8   # batch, clinical feats, max_mutations, mutation feats

    key = jax.random.PRNGKey(0)
    k_xc, k_xm, k_p = jax.random.split(key, 3)
    xc = jax.random.normal(k_xc, (B, Dc), dtype=jnp.float32)
    xm = jax.random.normal(k_xm, (B, M, Dm), dtype=jnp.float32)
    # emulate zero-padding of mutation rows for some patients (as custom_collate does);
    # like the PyTorch module, padded rows still pass through the encoder and the mean
    # divides by max_mutations — semantics preserved intentionally.
    pad_mask = (jnp.arange(M)[None, :] < jnp.array([17, 5, 9, 12])[:, None]).astype(jnp.float32)
    xm = xm * pad_mask[:, :, None]

    # TODO(synk): training-mode BatchNorm (batch statistics) and Dropout sampling are not
    # implemented; the kernel matches the module in eval() mode only.
    params = make_params(k_p, Dc, Dm)
    kparams = pack_params(params, Dc, Dm)

    out = combined_survival_forward(xc, xm, kparams)
    out = jax.block_until_ready(out)
    assert out.shape == (B, 1)

    # Tight check vs. a reference with identical bf16 quantization.
    ref_q = reference_forward_mirrored(xc, xm, params)
    np.testing.assert_allclose(np.asarray(out), np.asarray(ref_q), rtol=2e-3, atol=2e-3)

    # Looser check vs. the original full-f32 module semantics (bounds bf16 approx error).
    ref_f = reference_forward_f32(xc, xm, params)
    np.testing.assert_allclose(np.asarray(out), np.asarray(ref_f), rtol=5e-2, atol=5e-2)

    print("KERNEL_OK")
</pallas_src>

<mosaic_0001>
module attributes {stable_mosaic.version = 11 : i64} {
  func.func @combined_survival_kernel(%arg0: i32, %arg1: memref<8x16xf32, #tpu.memory_space<vmem>>, %arg2: memref<136x8xbf16, #tpu.memory_space<vmem>>, %arg3: memref<1x2688xf32, #tpu.memory_space<vmem>>, %arg4: memref<16x128xbf16, #tpu.memory_space<vmem>>, %arg5: memref<168x160xbf16, #tpu.memory_space<vmem>>, %arg6: memref<128x512xbf16, #tpu.memory_space<vmem>>, %arg7: memref<160x384xbf16, #tpu.memory_space<vmem>>, %arg8: memref<8x128xf32, #tpu.memory_space<vmem>>) attributes {dimension_semantics = [#tpu.dimension_semantics<parallel>], iteration_bounds = array<i64: 1>, scalar_prefetch = 0 : i64, scratch_operands = 0 : i64, tpu.core_type = #tpu.core_type<tc>, window_params = [{transform_indices = @transform_0, window_bounds = array<i64: 8, 16>}, {transform_indices = @transform_1, window_bounds = array<i64: 136, 8>}, {pipeline_mode = #tpu.pipeline_mode<synchronous>, transform_indices = @transform_2, window_bounds = array<i64: 1, 2688>}, {pipeline_mode = #tpu.pipeline_mode<synchronous>, transform_indices = @transform_3, window_bounds = array<i64: 16, 128>}, {pipeline_mode = #tpu.pipeline_mode<synchronous>, transform_indices = @transform_4, window_bounds = array<i64: 168, 160>}, {pipeline_mode = #tpu.pipeline_mode<synchronous>, transform_indices = @transform_5, window_bounds = array<i64: 128, 512>}, {pipeline_mode = #tpu.pipeline_mode<synchronous>, transform_indices = @transform_6, window_bounds = array<i64: 160, 384>}, {transform_indices = @transform_7, window_bounds = array<i64: 8, 128>}]} {
    %c0 = arith.constant 0 : index
    %c0_0 = arith.constant 0 : index
    %0 = vector.load %arg1[%c0, %c0_0] : memref<8x16xf32, #tpu.memory_space<vmem>>, vector<8x16xf32>
    %c0_1 = arith.constant 0 : index
    %c0_2 = arith.constant 0 : index
    %1 = vector.load %arg3[%c0_1, %c0_2] : memref<1x2688xf32, #tpu.memory_space<vmem>>, vector<1x16xf32>
    %2 = vector.broadcast %1 : vector<1x16xf32> to vector<8x16xf32>
    %3 = arith.mulf %0, %2 : vector<8x16xf32>
    %c0_3 = arith.constant 0 : index
    %c128 = arith.constant 128 : index
    %4 = vector.load %arg3[%c0_3, %c128] : memref<1x2688xf32, #tpu.memory_space<vmem>>, vector<1x16xf32>
    %5 = vector.broadcast %4 : vector<1x16xf32> to vector<8x16xf32>
    %6 = arith.addf %3, %5 : vector<8x16xf32>
    %7 = arith.truncf %6 : vector<8x16xf32> to vector<8x16xbf16>
    %c0_4 = arith.constant 0 : index
    %c0_5 = arith.constant 0 : index
    %8 = vector.load %arg4[%c0_4, %c0_5] : memref<16x128xbf16, #tpu.memory_space<vmem>>, vector<16x128xbf16>
    %cst = arith.constant dense<0.000000e+00> : vector<8x128xf32>
    %9 = tpu.matmul %7, %8, %cst {dimension_numbers = #tpu.dot_dimension_numbers<[1], [0], [0], [1], [0, 0, 1, 1], [], []>} : vector<8x16xbf16>, vector<16x128xbf16>, vector<8x128xf32> -> vector<8x128xf32>
    %c0_6 = arith.constant 0 : index
    %c256 = arith.constant 256 : index
    %10 = vector.load %arg3[%c0_6, %c256] : memref<1x2688xf32, #tpu.memory_space<vmem>>, vector<1x128xf32>
    %11 = vector.broadcast %10 : vector<1x128xf32> to vector<8x128xf32>
    %12 = arith.addf %9, %11 : vector<8x128xf32>
    %cst_7 = arith.constant 0.000000e+00 : f32
    %13 = vector.broadcast %cst_7 : f32 to vector<8x128xf32>
    %14 = arith.maximumf %12, %13 : vector<8x128xf32>
    %15 = arith.truncf %14 : vector<8x128xf32> to vector<8x128xbf16>
    %c0_8 = arith.constant 0 : index
    %c0_9 = arith.constant 0 : index
    %16 = vector.load %arg6[%c0_8, %c0_9] : memref<128x512xbf16, #tpu.memory_space<vmem>>, vector<128x128xbf16>
    %cst_10 = arith.constant dense<0.000000e+00> : vector<8x128xf32>
    %17 = tpu.matmul %15, %16, %cst_10 {dimension_numbers = #tpu.dot_dimension_numbers<[1], [0], [0], [1], [0, 0, 1, 1], [], []>} : vector<8x128xbf16>, vector<128x128xbf16>, vector<8x128xf32> -> vector<8x128xf32>
    %c0_11 = arith.constant 0 : index
    %c384 = arith.constant 384 : index
    %18 = vector.load %arg3[%c0_11, %c384] : memref<1x2688xf32, #tpu.memory_space<vmem>>, vector<1x128xf32>
    %19 = vector.broadcast %18 : vector<1x128xf32> to vector<8x128xf32>
    %20 = arith.addf %17, %19 : vector<8x128xf32>
    %c0_12 = arith.constant 0 : index
    %c0_13 = arith.constant 0 : index
    %21 = vector.load %arg2[%c0_12, %c0_13] : memref<136x8xbf16, #tpu.memory_space<vmem>>, vector<136x8xbf16>
    %c0_14 = arith.constant 0 : index
    %c0_15 = arith.constant 0 : index
    %22 = vector.load %arg5[%c0_14, %c0_15] : memref<168x160xbf16, #tpu.memory_space<vmem>>, vector<8x160xbf16>
    %cst_16 = arith.constant dense<0.000000e+00> : vector<136x160xf32>
    %23 = tpu.matmul %21, %22, %cst_16 {dimension_numbers = #tpu.dot_dimension_numbers<[1], [0], [0], [1], [0, 0, 1, 1], [], []>} : vector<136x8xbf16>, vector<8x160xbf16>, vector<136x160xf32> -> vector<136x160xf32>
    %c0_17 = arith.constant 0 : index
    %c512 = arith.constant 512 : index
    %24 = vector.load %arg3[%c0_17, %c512] : memref<1x2688xf32, #tpu.memory_space<vmem>>, vector<1x160xf32>
    %25 = vector.broadcast %24 : vector<1x160xf32> to vector<136x160xf32>
    %26 = arith.addf %23, %25 : vector<136x160xf32>
    %27 = math.tanh %26 : vector<136x160xf32>
    %28 = arith.truncf %27 : vector<136x160xf32> to vector<136x160xbf16>
    %c8 = arith.constant 8 : index
    %c0_18 = arith.constant 0 : index
    %29 = vector.load %arg5[%c8, %c0_18] : memref<168x160xbf16, #tpu.memory_space<vmem>>, vector<160x160xbf16>
    %cst_19 = arith.constant dense<0.000000e+00> : vector<136x160xf32>
    %30 = tpu.matmul %28, %29, %cst_19 {dimension_numbers = #tpu.dot_dimension_numbers<[1], [0], [0], [1], [0, 0, 1, 1], [], []>} : vector<136x160xbf16>, vector<160x160xbf16>, vector<136x160xf32> -> vector<136x160xf32>
    %c0_20 = arith.constant 0 : index
    %c768 = arith.constant 768 : index
    %31 = vector.load %arg3[%c0_20, %c768] : memref<1x2688xf32, #tpu.memory_space<vmem>>, vector<1x160xf32>
    %32 = vector.broadcast %31 : vector<1x160xf32> to vector<136x160xf32>
    %33 = arith.addf %30, %32 : vector<136x160xf32>
    %34 = tpu.iota {dimensions = array<i32: 0>} : vector<8x136xi32>
    %35 = tpu.iota {dimensions = array<i32: 1>} : vector<8x136xi32>
    %c17_i32 = arith.constant 17 : i32
    %36 = vector.broadcast %c17_i32 : i32 to vector<8x136xi32>
    %37 = arith.muli %34, %36 : vector<8x136xi32>
    %38 = arith.cmpi sge, %35, %37 : vector<8x136xi32>
    %c17_i32_21 = arith.constant 17 : i32
    %39 = vector.broadcast %c17_i32_21 : i32 to vector<8x136xi32>
    %40 = arith.addi %37, %39 : vector<8x136xi32>
    %41 = arith.cmpi slt, %35, %40 : vector<8x136xi32>
    %42 = arith.andi %38, %41 : vector<8x136xi1>
    %cst_22 = arith.constant 1.000000e+00 : f32
    %cst_23 = arith.constant 0.000000e+00 : f32
    %43 = vector.broadcast %cst_22 : f32 to vector<8x136xf32>
    %44 = vector.broadcast %cst_23 : f32 to vector<8x136xf32>
    %45 = arith.select %42, %43, %44 : vector<8x136xi1>, vector<8x136xf32>
    %46 = arith.truncf %45 : vector<8x136xf32> to vector<8x136xbf16>
    %47 = arith.truncf %33 : vector<136x160xf32> to vector<136x160xbf16>
    %cst_24 = arith.constant dense<0.000000e+00> : vector<8x160xf32>
    %48 = tpu.matmul %46, %47, %cst_24 {dimension_numbers = #tpu.dot_dimension_numbers<[1], [0], [0], [1], [0, 0, 1, 1], [], []>} : vector<8x136xbf16>, vector<136x160xbf16>, vector<8x160xf32> -> vector<8x160xf32>
    %cst_25 = arith.constant 0.0588235296 : f32
    %49 = vector.broadcast %cst_25 : f32 to vector<8x160xf32>
    %50 = arith.mulf %48, %49 : vector<8x160xf32>
    %c0_26 = arith.constant 0 : index
    %c1024 = arith.constant 1024 : index
    %51 = vector.load %arg3[%c0_26, %c1024] : memref<1x2688xf32, #tpu.memory_space<vmem>>, vector<1x128xf32>
    %52 = vector.broadcast %51 : vector<1x128xf32> to vector<8x128xf32>
    %53 = arith.mulf %20, %52 : vector<8x128xf32>
    %c0_27 = arith.constant 0 : index
    %c1152 = arith.constant 1152 : index
    %54 = vector.load %arg3[%c0_27, %c1152] : memref<1x2688xf32, #tpu.memory_space<vmem>>, vector<1x128xf32>
    %55 = vector.broadcast %54 : vector<1x128xf32> to vector<8x128xf32>
    %56 = arith.addf %53, %55 : vector<8x128xf32>
    %c0_28 = arith.constant 0 : index
    %c1280 = arith.constant 1280 : index
    %57 = vector.load %arg3[%c0_28, %c1280] : memref<1x2688xf32, #tpu.memory_space<vmem>>, vector<1x160xf32>
    %58 = vector.broadcast %57 : vector<1x160xf32> to vector<8x160xf32>
    %59 = arith.mulf %50, %58 : vector<8x160xf32>
    %c0_29 = arith.constant 0 : index
    %c1536 = arith.constant 1536 : index
    %60 = vector.load %arg3[%c0_29, %c1536] : memref<1x2688xf32, #tpu.memory_space<vmem>>, vector<1x160xf32>
    %61 = vector.broadcast %60 : vector<1x160xf32> to vector<8x160xf32>
    %62 = arith.addf %59, %61 : vector<8x160xf32>
    %63 = arith.truncf %56 : vector<8x128xf32> to vector<8x128xbf16>
    %c0_30 = arith.constant 0 : index
    %c128_31 = arith.constant 128 : index
    %64 = vector.load %arg6[%c0_30, %c128_31] : memref<128x512xbf16, #tpu.memory_space<vmem>>, vector<128x384xbf16>
    %cst_32 = arith.constant dense<0.000000e+00> : vector<8x384xf32>
    %65 = tpu.matmul %63, %64, %cst_32 {dimension_numbers = #tpu.dot_dimension_numbers<[1], [0], [0], [1], [0, 0, 1, 1], [], []>} : vector<8x128xbf16>, vector<128x384xbf16>, vector<8x384xf32> -> vector<8x384xf32>
    %66 = arith.truncf %62 : vector<8x160xf32> to vector<8x160xbf16>
    %c0_33 = arith.constant 0 : index
    %c0_34 = arith.constant 0 : index
    %67 = vector.load %arg7[%c0_33, %c0_34] : memref<160x384xbf16, #tpu.memory_space<vmem>>, vector<160x384xbf16>
    %cst_35 = arith.constant dense<0.000000e+00> : vector<8x384xf32>
    %68 = tpu.matmul %66, %67, %cst_35 {dimension_numbers = #tpu.dot_dimension_numbers<[1], [0], [0], [1], [0, 0, 1, 1], [], []>} : vector<8x160xbf16>, vector<160x384xbf16>, vector<8x384xf32> -> vector<8x384xf32>
    %69 = arith.addf %65, %68 : vector<8x384xf32>
    %c0_36 = arith.constant 0 : index
    %c1792 = arith.constant 1792 : index
    %70 = vector.load %arg3[%c0_36, %c1792] : memref<1x2688xf32, #tpu.memory_space<vmem>>, vector<1x384xf32>
    %71 = vector.broadcast %70 : vector<1x384xf32> to vector<8x384xf32>
    %72 = arith.addf %69, %71 : vector<8x384xf32>
    %73 = math.tanh %72 : vector<8x384xf32>
    %c0_37 = arith.constant 0 : index
    %c2176 = arith.constant 2176 : index
    %74 = vector.load %arg3[%c0_37, %c2176] : memref<1x2688xf32, #tpu.memory_space<vmem>>, vector<1x384xf32>
    %75 = vector.broadcast %74 : vector<1x384xf32> to vector<8x384xf32>
    %76 = arith.mulf %73, %75 : vector<8x384xf32>
    %cst_38 = arith.constant dense<0.000000e+00> : vector<8xf32>
    %77 = vector.multi_reduction <add>, %76, %cst_38 [1] : vector<8x384xf32> to vector<8xf32>
    %78 = vector.shape_cast %77 : vector<8xf32> to vector<8x1xf32>
    %c0_39 = arith.constant 0 : index
    %c2560 = arith.constant 2560 : index
    %79 = vector.load %arg3[%c0_39, %c2560] : memref<1x2688xf32, #tpu.memory_space<vmem>>, vector<1x1xf32>
    %80 = vector.broadcast %79 : vector<1x1xf32> to vector<8x1xf32>
    %81 = arith.addf %78, %80 : vector<8x1xf32>
    %82 = vector.shape_cast %81 : vector<8x1xf32> to vector<8x1xf32>
    %83 = vector.broadcast %82 : vector<8x1xf32> to vector<8x128xf32>
    %c0_40 = arith.constant 0 : index
    %c0_41 = arith.constant 0 : index
    %84 = vector.load %arg8[%c0_40, %c0_41] : memref<8x128xf32, #tpu.memory_space<vmem>>, vector<8x128xf32>
    tpu.vector_store %arg8[%c0_40, %c0_41], %83 {strides = array<i32>} : memref<8x128xf32, #tpu.memory_space<vmem>>, vector<8x128xf32>,
    return
  }
  func.func @transform_0(%arg0: i32) -> (i32, i32) {
    %c0_i32 = arith.constant 0 : i32
    %c0_i32_0 = arith.constant 0 : i32
    return %arg0, %c0_i32 : i32, i32
  }
  func.func @transform_1(%arg0: i32) -> (i32, i32) {
    %c0_i32 = arith.constant 0 : i32
    %c0_i32_0 = arith.constant 0 : i32
    return %arg0, %c0_i32 : i32, i32
  }
  func.func @transform_2(%arg0: i32) -> (i32, i32) {
    %c0_i32 = arith.constant 0 : i32
    %c0_i32_0 = arith.constant 0 : i32
    %c0_i32_1 = arith.constant 0 : i32
    return %c0_i32, %c0_i32_0 : i32, i32
  }
  func.func @transform_3(%arg0: i32) -> (i32, i32) {
    %c0_i32 = arith.constant 0 : i32
    %c0_i32_0 = arith.constant 0 : i32
    %c0_i32_1 = arith.constant 0 : i32
    return %c0_i32, %c0_i32_0 : i32, i32
  }
  func.func @transform_4(%arg0: i32) -> (i32, i32) {
    %c0_i32 = arith.constant 0 : i32
    %c0_i32_0 = arith.constant 0 : i32
    %c0_i32_1 = arith.constant 0 : i32
    return %c0_i32, %c0_i32_0 : i32, i32
  }
  func.func @transform_5(%arg0: i32) -> (i32, i32) {
    %c0_i32 = arith.constant 0 : i32
    %c0_i32_0 = arith.constant 0 : i32
    %c0_i32_1 = arith.constant 0 : i32
    return %c0_i32, %c0_i32_0 : i32, i32
  }
  func.func @transform_6(%arg0: i32) -> (i32, i32) {
    %c0_i32 = arith.constant 0 : i32
    %c0_i32_0 = arith.constant 0 : i32
    %c0_i32_1 = arith.constant 0 : i32
    return %c0_i32, %c0_i32_0 : i32, i32
  }
  func.func @transform_7(%arg0: i32) -> (i32, i32) {
    %c0_i32 = arith.constant 0 : i32
    %c0_i32_0 = arith.constant 0 : i32
    return %arg0, %c0_i32 : i32, i32
  }
}

</mosaic_0001>

<bundles_post_ra>
// kernel: tpu_custom_call.1
= control target key start
LH: loop header
LB: loop body
LE: loop exit
PB: predicated region body
PF: predicated region fallthrough
CT: control target
= control target key end

     0   :  { %12 = vsyncpa [#allocation3], 0  ;;  %s2486_s0 = inlined_call_operand.vmem [shape: f32[8,16], index: 0, kind: input, shape index: {}]   ;;  %s2487_s1 = inlined_call_operand.vmem [shape: bf16[136,8], index: 1, kind: input, shape index: {}]   ;;  %s2488_s2 = inlined_call_operand.vmem [shape: f32[1,2688], index: 2, kind: input, shape index: {}]   ;;  %s2489_s3 = inlined_call_operand.vmem [shape: bf16[16,128], index: 3, kind: input, shape index: {}]   ;;  %s2490_s4 = inlined_call_operand.vmem [shape: bf16[168,160], index: 4, kind: input, shape index: {}]   ;;  %s2491_s5 = inlined_call_operand.vmem [shape: bf16[128,512], index: 5, kind: input, shape index: {}]   ;;  %s2492_s6 = inlined_call_operand.hbm [shape: bf16[160,384], index: 6, kind: input, shape index: {}]   ;;  %s2493_s7 = inlined_call_operand.hbm [shape: f32[8,128], index: 7, kind: output, shape index: {}]  }
   0x1   :  { %13 = vsyncpa [#allocation4], 0  ;;  %s1976_s24 = smov [#allocation2]  }
   0x2   :  { %s31_s25 = sshll.u32 %s1976_s24, 4  ;;  %s32_s25 = int_to_ptr.vmem [resolvable:$true] %s31_s25 }
   0x3   :  { %s1940_s26 = scalar_lea.vmem %s32_s25, 3840  ;;  %p1945_p1 = scmp.lt.s32.totalorder %s32_s25, %s32_s25 }
   0x4   :  { %p1941_p0 = scmp.ne.s32.totalorder %s32_s25, %s1940_s26  ;;  %p1946_p2 = scmp.lt.s32.totalorder %s1940_s26, %s1940_s26 }
   0x6   :  { %p1947_p3 = por %p1946_p2, %p1945_p1 }
   0x8   :  { %p1948_p4 = pnand %p1947_p3, %p1941_p0 }
   0xa   :  { %1951 = shalt.err (!%p1948_p4)
}
   0xb   :  { %s1977_s27 = smov 192   ;;  %s1978_s28 = smov 12  }
   0xc   :  { %37 = dma.hbm_to_vmem [thread:$0]  %s2492_s6, 3840, %s32_s25, [#allocation3], %s1977_s27, %s1977_s27, %s1978_s28  }
   0xd   :  { %1972 = dma.done.wait [#allocation3], 3840  }
   0xe   :  { %1973 = vsyncadd [#allocation3], 4294963456  ;;  %v1979_v0 = vmov 0.0   ;;  %vm1980_vm0 = vmmov 0   ;;  %v1981_v1 = vmov 0   ;;  %v1736_v2 = vld [vmem:[%s2489_s3] sm:$0xff]   ;;  %v252_v31 = vlaneseq }
   0xf   :  { %1681 = vmatprep.subr.bf16.mxu0 %v1979_v0  ;;  %1683 = vmatprep.mubr.msk.bf16.mxu0 %vm1980_vm0, %v1979_v0  ;;  %v42_v3 = vld [vmem:[%s2486_s0] sm:$0xff]  ;;  %vm338_vm1 = vcmask 1043456   ;;  %vm75_vm2 = vcmask 130048   ;;  %vm310_vm3 = vcmask 64512   ;;  %v1740_v17 = vld [vmem:[%s2487_s1 + $0x8] sm:$0xff]   ;;  %v1741_v20 = vld [vmem:[%s2487_s1 + $0x10] sm:$0xff]  }
  0x10   :  { %1687 = vmatprep.subr.bf16.mxu1 %v1979_v0  ;;  %1703 = vmatprep.mubr.msk.bf16.mxu1 %vm1980_vm0, %v1979_v0  ;;  %v1534_v4 = vld [vmem:[%s2488_s2] ss:$0 sm:$0xff]  ;;  %v1535_v5 = vld [vmem:[%s2488_s2 + $0x1] ss:$0 sm:$0xff]  ;;  %v1742_v23 = vld [vmem:[%s2487_s1 + $0x18] sm:$0xff]   ;;  %v2134_v33 = vshrl.u32 %v252_v31, 7 }
  0x11   :  { %1735 = vset.pattern.permute.xlu0 %v1981_v1  ;;  %1682 = vmatpush3.bf16.msra.mxu0 %v1736_v2  ;;  %v50_v6 = vmul.f32 %v1534_v4, %v42_v3  ;;  %v249_v7 = vld [vmem:[%s2490_s4] sm:$0xff]  ;;  %v1744_v25 = vld [vmem:[%s2487_s1 + $0x28] sm:$0xff]   ;;  %v1745_v26 = vld [vmem:[%s2487_s1 + $0x30] sm:$0xff]   ;;  %vm650_vm4 = vcmask 261120   ;;  %s1983_s21 = smov [#allocation5]  }
  0x12   :  { %v1558_v8 = vcombine.high %v249_v7, %v249_v7  ;;  %v1557_v9 = vcombine.low %v249_v7, %v249_v7  ;;  %v1748_v13 = vld [vmem:[%s2491_s5 + $0xe0] ss:$16 sps:$4 sm:$0xff]   ;;  %v1746_v27 = vld [vmem:[%s2487_s1 + $0x38] sm:$0xff]   ;;  %v2137_v38 = vsub.s32 1, %v2134_v33  ;;  %v250_v41 = vld [vmem:[%s2488_s2 + $0x4] sm:$0x3] }
  0x13   :  { %v58_v10 = vadd.f32 %v1535_v5, %v50_v6  ;;  %v1739_v14 = vld [vmem:[%s2487_s1] sm:$0xff]   ;;  %1688 = vmatpush3.bf16.msra.mxu1 %v1748_v13  ;;  %v1761_v43 = vld [vmem:[%s2490_s4 + $0x6c] ss:$8 sps:$4 sm:$0xff]   ;;  %v1759_v46 = vld [vmem:[%s2490_s4 + $0x68] ss:$8 sps:$4 sm:$0xff]   ;;  %v2165_v54 = vsub.s32 0, %v2134_v33 }
  0x14   :  { %1559 = vmatprep.subr.msk.bf16.mxu0 %vm338_vm1, %v1558_v8  ;;  %v340_v12 = vsel %vm338_vm1, %v1557_v9, 0  ;;  %v1749_v15 = vld [vmem:[%s2491_s5 + $0xc0] ss:$16 sps:$4 sm:$0xff]   ;;  %1689 = vmatprep.subr.bf16.mxu1 %v1979_v0  ;;  %v1758_v30 = vld [vmem:[%s2490_s4 + $0x7c] ss:$8 sps:$4 sm:$0xff]   ;;  %v2149_v45 = vrot.slane %v250_v41, %v2137_v38  ;;  %s1525_s22 = sshll.u32 %s1983_s21, 4  ;;  %s1526_s22 = int_to_ptr.vmem [resolvable:$true] %s1525_s22 }
  0x15   :  { %v59_v11 = vpack.c.bf16 %v58_v10, %v58_v10  ;;  %v1750_v16 = vld [vmem:[%s2491_s5 + $0xa0] ss:$16 sps:$4 sm:$0xff]   ;;  %v1764_v48 = vld [vmem:[%s2490_s4 + $0x5c] ss:$8 sps:$4 sm:$0xff]   ;;  %v1767_v53 = vld [vmem:[%s2490_s4 + $0x4c] ss:$8 sps:$4 sm:$0xff]   ;;  %v2175_v60 = vrot.slane %v250_v41, %v2165_v54  ;;  %p1957_p6 = scmp.lt.s32.totalorder %s1526_s22, %s1526_s22 }
  0x16   :  { %v1751_v18 = vld [vmem:[%s2491_s5 + $0x80] ss:$16 sps:$4 sm:$0xff]   ;;  %v1770_v59 = vld [vmem:[%s2490_s4 + $0x3c] ss:$8 sps:$4 sm:$0xff]   ;;  %v1773_v2 = vld [vmem:[%s2490_s4 + $0x2c] ss:$8 sps:$4 sm:$0xff]  }
  0x17   :  { %1684 = vmatmul.mubr.msk.bf16.vlgmr.msra.gmra.mxu0 %vm75_vm2, %v59_v11  ;;  %1690 = vmatpush3.bf16.msra.mxu1 %v1749_v15  ;;  %v1752_v19 = vld [vmem:[%s2491_s5 + $0x60] ss:$16 sps:$4 sm:$0xff]   ;;  %v1776_v10 = vld [vmem:[%s2490_s4 + $0x1c] ss:$8 sps:$4 sm:$0xff]   ;;  %v1779_v15 = vld [vmem:[%s2490_s4 + $0xc] ss:$8 sps:$4 sm:$0xff]  }
  0x18   :  { %360 = vmatpush1.bf16.msra.mxu0 %v340_v12  ;;  %377 = vmatprep.mubr.bf16.mxu0 %v1981_v1  ;;  %v1753_v21 = vld [vmem:[%s2491_s5 + $0x40] ss:$16 sps:$4 sm:$0xff]   ;;  %s1952_s23 = scalar_lea.vmem %s1526_s22, 128 }
  0x19   :  { %1691 = vmatprep.subr.bf16.mxu1 %v1979_v0  ;;  %v1754_v22 = vld [vmem:[%s2491_s5 + $0x20] ss:$16 sps:$4 sm:$0xff]   ;;  %p1953_p5 = scmp.ne.s32.totalorder %s1526_s22, %s1952_s23  ;;  %p1958_p7 = scmp.lt.s32.totalorder %s1952_s23, %s1952_s23 }
  0x1a   :  { %v1743_v24 = vld [vmem:[%s2487_s1 + $0x20] sm:$0xff]   ;;  %v1765_v57 = vld [vmem:[%s2490_s4 + $0x48] ss:$8 sps:$4 sm:$0xff]  }
  0x1b   :  { %1692 = vmatpush3.bf16.msra.mxu1 %v1750_v16  ;;  %v1755_v28 = vld [vmem:[%s2491_s5] ss:$16 sps:$4 sm:$0xff]   ;;  %p1959_p8 = por %p1958_p7, %p1957_p6 }
  0x1c   :  { %1693 = vmatprep.subr.bf16.mxu1 %v1979_v0  ;;  %v1747_v29 = vld [vmem:[%s2487_s1 + $0x40] ss:$0 sps:$4 sm:$0xff]   ;;  %v1536_v32 = vld [vmem:[%s2488_s2 + $0x2] ss:$0 sm:$0xff]  ;;  %v1771_v6 = vld [vmem:[%s2490_s4 + $0x28] ss:$8 sps:$4 sm:$0xff]  }
  0x1d   :  { %v1756_v40 = vld [vmem:[%s2490_s4 + $0x78] ss:$8 sps:$4 sm:$0xff]   ;;  %p1960_p9 = pnand %p1959_p8, %p1953_p5 }
  0x1e   :  { %v1762_v51 = vld [vmem:[%s2490_s4 + $0x58] ss:$8 sps:$4 sm:$0xff]  }
  0x1f   :  { %1560 = vmatmul.mubr.msk.bf16.vlgmr.msra.gmra.mxu0 %vm310_vm3, %v1739_v14  ;;  %1694 = vmatpush3.bf16.msra.mxu1 %v1751_v18  ;;  %v1768_v62 = vld [vmem:[%s2490_s4 + $0x38] ss:$8 sps:$4 sm:$0xff]  }
  0x20   :  { %387 = vmatprep.mubr.bf16.mxu0 %v1981_v1  ;;  %1695 = vmatprep.subr.bf16.mxu1 %v1979_v0  ;;  %v1774_v13 = vld [vmem:[%s2490_s4 + $0x18] ss:$8 sps:$4 sm:$0xff]  }
  0x23   :  { %1696 = vmatpush3.bf16.msra.mxu1 %v1752_v19 }
  0x24   :  { %1697 = vmatprep.subr.bf16.mxu1 %v1979_v0 }
  0x27   :  { %1561 = vmatmul.mubr.msk.bf16.gmra.mxu0 %vm310_vm3, %v1740_v17  ;;  %1698 = vmatpush3.bf16.msra.mxu1 %v1753_v21  ;;  %v1777_v21 = vld [vmem:[%s2490_s4 + $0x8] ss:$8 sps:$4 sm:$0xff]  }
  0x28   :  { %397 = vmatprep.mubr.bf16.mxu0 %v1981_v1  ;;  %1699 = vmatprep.subr.bf16.mxu1 %v1979_v0 }
  0x2b   :  { %1700 = vmatpush3.bf16.msra.mxu1 %v1754_v22 }
  0x2c   :  { %1701 = vmatprep.subr.bf16.mxu1 %v1979_v0 }
  0x2f   :  { %1562 = vmatmul.mubr.msk.bf16.gmra.mxu0 %vm310_vm3, %v1741_v20  ;;  %1702 = vmatpush3.bf16.msra.mxu1 %v1755_v28 }
  0x30   :  { %407 = vmatprep.mubr.bf16.mxu0 %v1981_v1  ;;  %678 = vmatprep.subr.bf16.mxu1 %v1758_v30 }
  0x37   :  { %1563 = vmatmul.mubr.msk.bf16.gmra.mxu0 %vm310_vm3, %v1742_v23 }
  0x38   :  { %417 = vmatprep.mubr.bf16.mxu0 %v1981_v1 }
  0x3f   :  { %1564 = vmatmul.mubr.msk.bf16.gmra.mxu0 %vm310_vm3, %v1743_v24 }
  0x40   :  { %427 = vmatprep.mubr.bf16.mxu0 %v1981_v1 }
  0x47   :  { %1565 = vmatmul.mubr.msk.bf16.gmra.mxu0 %vm310_vm3, %v1744_v25  ;;  %v1782_v25 = vld [vmem:[%s2490_s4 + $0x9c] ss:$8 sps:$4 sm:$0xff]  }
  0x48   :  { %437 = vmatprep.mubr.bf16.mxu0 %v1981_v1 }
  0x4f   :  { %1566 = vmatmul.mubr.msk.bf16.gmra.mxu0 %vm310_vm3, %v1745_v26 }
  0x50   :  { %447 = vmatprep.mubr.bf16.mxu0 %v1981_v1 }
  0x57   :  { %1567 = vmatmul.mubr.msk.bf16.gmra.mxu0 %vm310_vm3, %v1746_v27  ;;  %v1780_v27 = vld [vmem:[%s2490_s4 + $0x98] ss:$8 sps:$4 sm:$0xff]  }
  0x58   :  { %457 = vmatprep.mubr.bf16.mxu0 %v1981_v1 }
  0x5f   :  { %1568 = vmatmul.mubr.msk.bf16.gmra.mxu0 %vm310_vm3, %v1747_v29  ;;  %v1785_v29 = vld [vmem:[%s2490_s4 + $0x8c] ss:$8 sps:$4 sm:$0xff]  }
  0xd7   :  { %v113_v34 = vpop.f32.mrf.mxu0 }
  0xd8   :  { %v114_v35 = vadd.f32 %v1536_v32, %v113_v34 }
  0xd9   :  { %v1685_v36 = vpop.f32.mrf.mxu0 }
  0xda   :  { %v119_v37 = vmax.f32 %v114_v35, 0.0 }
  0xdb   :  { %v116_v39 = vpop.f32.mrf.mxu0 }
  0xdc   :  { %v120_v42 = vpack.c.bf16 %v119_v37, %v119_v37  ;;  %v1783_v37 = vld [vmem:[%s2490_s4 + $0x88] ss:$8 sps:$4 sm:$0xff]  }
  0xdd   :  { %v1686_v44 = vpop.f32.mrf.mxu0 }
  0xde   :  { %1704 = vmatmul.mubr.bf16.vlgmr.msra.gmra.mxu1 %v120_v42 }
  0xdf   :  { %679 = vmatpush1.bf16.msra.mxu1 %v1756_v40  ;;  %v379_v47 = vpop.f32.mrf.mxu0 }
  0xe0   :  { %680 = vmatprep.subr.bf16.mxu1 %v1761_v43  ;;  %v380_v3 = vadd.f32 %v379_v47, %v2175_v60 }
  0xe1   :  { %v381_v49 = vpop.f32.mrf.mxu0 }
  0xe2   :  { %v382_v50 = vadd.f32 %v381_v49, %v2149_v45 }
  0xe3   :  { %681 = vmatpush1.bf16.msra.mxu1 %v1759_v46  ;;  %v383_v52 = vpop.f32.mrf.mxu0 }
  0xe4   :  { %682 = vmatprep.subr.bf16.mxu1 %v1764_v48  ;;  %1858 = vtanh.f32 %v382_v50  ;;  %v384_v9 = vadd.f32 %v383_v52, %v2175_v60 }
  0xe5   :  { %v385_v55 = vpop.f32.mrf.mxu0 }
  0xe6   :  { %v386_v56 = vadd.f32 %v385_v55, %v2149_v45 }
  0xe7   :  { %683 = vmatpush1.bf16.msra.mxu1 %v1762_v51  ;;  %v389_v58 = vpop.f32.mrf.mxu0 }
  0xe8   :  { %684 = vmatprep.subr.bf16.mxu1 %v1767_v53  ;;  %1860 = vtanh.f32 %v386_v56  ;;  %v390_v17 = vadd.f32 %v389_v58, %v2175_v60 }
  0xe9   :  { %v391_v61 = vpop.f32.mrf.mxu0  ;;  %1862 = vtanh.f32 %v380_v3 }
  0xea   :  { %v392_v5 = vadd.f32 %v391_v61, %v2149_v45 }
  0xeb   :  { %685 = vmatpush1.bf16.msra.mxu1 %v1765_v57  ;;  %v393_v63 = vpop.f32.mrf.mxu0 }
  0xec   :  { %686 = vmatprep.subr.bf16.mxu1 %v1770_v59  ;;  %1864 = vtanh.f32 %v392_v5  ;;  %v394_v24 = vadd.f32 %v393_v63, %v2175_v60 }
  0xed   :  { %v395_v4 = vpop.f32.mrf.mxu0 }
  0xee   :  { %v396_v7 = vadd.f32 %v395_v4, %v2149_v45 }
  0xef   :  { %687 = vmatpush1.bf16.msra.mxu1 %v1768_v62  ;;  %v399_v8 = vpop.f32.mrf.mxu0 }
  0xf0   :  { %688 = vmatprep.subr.bf16.mxu1 %v1773_v2  ;;  %1866 = vtanh.f32 %v396_v7  ;;  %v400_v30 = vadd.f32 %v399_v8, %v2175_v60 }
  0xf1   :  { %v401_v11 = vpop.f32.mrf.mxu0  ;;  %v1859_v12 = vpop.eup %1858  ;;  %1868 = vtanh.f32 %v384_v9 }
  0xf2   :  { %v402_v19 = vadd.f32 %v401_v11, %v2149_v45  ;;  %1870 = vtanh.f32 %v390_v17 }
  0xf3   :  { %689 = vmatpush1.bf16.msra.mxu1 %v1771_v6  ;;  %v403_v14 = vpop.f32.mrf.mxu0 }
  0xf4   :  { %690 = vmatprep.subr.bf16.mxu1 %v1776_v10  ;;  %1872 = vtanh.f32 %v402_v19  ;;  %v404_v42 = vadd.f32 %v403_v14, %v2175_v60 }
  0xf5   :  { %v1861_v16 = vpop.eup %1860  ;;  %v405_v18 = vpop.f32.mrf.mxu0 }
  0xf6   :  { %v501_v20 = vpack.c.bf16 %v1861_v16, %v1859_v12  ;;  %v406_v22 = vadd.f32 %v405_v18, %v2149_v45  ;;  %v1863_v34 = vpop.eup %1862 }
  0xf7   :  { %691 = vmatpush1.bf16.msra.mxu1 %v1774_v13  ;;  %v409_v23 = vpop.f32.mrf.mxu0 }
  0xf8   :  { %692 = vmatprep.subr.bf16.mxu1 %v1779_v15  ;;  %1589 = vmatprep.mubr.msk.bf16.mxu1 %vm650_vm4, %v501_v20  ;;  %1874 = vtanh.f32 %v406_v22  ;;  %v410_v49 = vadd.f32 %v409_v23, %v2175_v60 }
  0xf9   :  { %v411_v26 = vpop.f32.mrf.mxu0  ;;  %1876 = vtanh.f32 %v394_v24  ;;  %v1865_v36 = vpop.eup %1864 }
  0xfa   :  { %v412_v35 = vadd.f32 %v411_v26, %v2149_v45  ;;  %1878 = vtanh.f32 %v400_v30 }
  0xfb   :  { %693 = vmatpush1.bf16.msra.mxu1 %v1777_v21  ;;  %v413_v28 = vpop.f32.mrf.mxu0 }
  0xfc   :  { %706 = vmatprep.subr.bf16.mxu1 %v1782_v25  ;;  %1880 = vtanh.f32 %v412_v35  ;;  %v414_v58 = vadd.f32 %v413_v28, %v2175_v60 }
  0xfd   :  { %v415_v32 = vpop.f32.mrf.mxu0  ;;  %v1867_v41 = vpop.eup %1866 }
  0xfe   :  { %v416_v39 = vadd.f32 %v415_v32, %v2149_v45  ;;  %v1869_v43 = vpop.eup %1868  ;;  %v503_v46 = vpack.c.bf16 %v1867_v41, %v1865_v36 }
  0xff   :  { %707 = vmatpush2.bf16.msra.mxu1 %v1780_v27  ;;  %v419_v40 = vpop.f32.mrf.mxu0  ;;  %v500_v48 = vpack.c.bf16 %v1869_v43, %v1863_v34  ;;  %v1871_v51 = vpop.eup %1870 }
 0x100   :  { %708 = vmatprep.subr.bf16.mxu1 %v1785_v29  ;;  %1882 = vtanh.f32 %v416_v39  ;;  %v420_v3 = vadd.f32 %v419_v40, %v2175_v60 }
 0x101   :  { %v421_v44 = vpop.f32.mrf.mxu0  ;;  %1884 = vtanh.f32 %v404_v42  ;;  %v1873_v53 = vpop.eup %1872 }
 0x102   :  { %v422_v52 = vadd.f32 %v421_v44, %v2149_v45  ;;  %1886 = vtanh.f32 %v410_v49 }
 0x103   :  { %709 = vmatpush2.bf16.msra.mxu1 %v1783_v37  ;;  %v423_v47 = vpop.f32.mrf.mxu0 }
 0x104   :  { %1209 = vmatprep.subr.bf16.mxu1 %v1981_v1  ;;  %1888 = vtanh.f32 %v422_v52  ;;  %v424_v11 = vadd.f32 %v423_v47, %v2175_v60 }
 0x105   :  { %v425_v50 = vpop.f32.mrf.mxu0  ;;  %v1875_v57 = vpop.eup %1874 }
 0x106   :  { %711 = vmatmul.mubr.bf16.vlgmr.msra.gmra.mxu1 %v500_v48  ;;  %v426_v55 = vadd.f32 %v425_v50, %v2149_v45  ;;  %v1877_v59 = vpop.eup %1876  ;;  %v505_v62 = vpack.c.bf16 %v1875_v57, %v1873_v53 }
 0x107   :  { %1590 = vmatprep.mubr.msk.bf16.mxu1 %vm650_vm4, %v503_v46  ;;  %v429_v56 = vpop.f32.mrf.mxu0  ;;  %v502_v2 = vpack.c.bf16 %v1877_v59, %v1871_v51  ;;  %v1879_v5 = vpop.eup %1878 }
 0x108   :  { %1890 = vtanh.f32 %v426_v55  ;;  %v430_v17 = vadd.f32 %v429_v56, %v2175_v60 }
 0x109   :  { %v431_v61 = vpop.f32.mrf.mxu0  ;;  %1892 = vtanh.f32 %v414_v58  ;;  %v1881_v7 = vpop.eup %1880 }
 0x10a   :  { %v432_v6 = vadd.f32 %v431_v61, %v2149_v45  ;;  %1894 = vtanh.f32 %v420_v3 }
 0x10b   :  { %v433_v63 = vpop.f32.mrf.mxu0 }
 0x10c   :  { %1896 = vtanh.f32 %v432_v6  ;;  %v434_v25 = vadd.f32 %v433_v63, %v2175_v60 }
 0x10d   :  { %v435_v4 = vpop.f32.mrf.mxu0  ;;  %v1883_v10 = vpop.eup %1882 }
 0x10e   :  { %721 = vmatmul.mubr.bf16.gmra.mxu1 %v502_v2  ;;  %v436_v8 = vadd.f32 %v435_v4, %v2149_v45  ;;  %v1885_v12 = vpop.eup %1884  ;;  %v507_v14 = vpack.c.bf16 %v1883_v10, %v1881_v7 }
 0x10f   :  { %1591 = vmatprep.mubr.msk.bf16.mxu1 %vm650_vm4, %v505_v62  ;;  %v439_v9 = vpop.f32.mrf.mxu0  ;;  %v504_v16 = vpack.c.bf16 %v1885_v12, %v1879_v5  ;;  %v1887_v19 = vpop.eup %1886 }
 0x110   :  { %1898 = vtanh.f32 %v436_v8  ;;  %v440_v32 = vadd.f32 %v439_v9, %v2175_v60 }
 0x111   :  { %v441_v13 = vpop.f32.mrf.mxu0  ;;  %1900 = vtanh.f32 %v424_v11  ;;  %v1889_v21 = vpop.eup %1888 }
 0x112   :  { %v442_v20 = vadd.f32 %v441_v13, %v2149_v45  ;;  %1902 = vtanh.f32 %v430_v17 }
 0x113   :  { %v443_v15 = vpop.f32.mrf.mxu0 }
 0x114   :  { %1904 = vtanh.f32 %v442_v20  ;;  %v444_v42 = vadd.f32 %v443_v15, %v2175_v60  ;;  %v804_v15 = vmul.u32 17, %v2134_v33 }
 0x115   :  { %v445_v18 = vpop.f32.mrf.mxu0  ;;  %v1891_v24 = vpop.eup %1890 }
 0x116   :  { %731 = vmatmul.mubr.bf16.gmra.mxu1 %v504_v16  ;;  %v446_v22 = vadd.f32 %v445_v18, %v2149_v45  ;;  %v1893_v26 = vpop.eup %1892  ;;  %v509_v28 = vpack.c.bf16 %v1891_v24, %v1889_v21  ;;  %v807_v18 = vadd.s32 17, %v804_v15  ;;  %v1801_v24 = vld [vmem:[#allocation2 + $0x68] ss:$12 sps:$4 sm:$0xff]  }
 0x117   :  { %1592 = vmatprep.mubr.msk.bf16.mxu1 %vm650_vm4, %v507_v14  ;;  %v449_v23 = vpop.f32.mrf.mxu0  ;;  %v506_v30 = vpack.c.bf16 %v1893_v26, %v1887_v19  ;;  %v1895_v35 = vpop.eup %1894  ;;  %v802_v14 = vand.u32 127, %v252_v31  ;;  %v1789_v31 = vld [vmem:[#allocation2 + $0xb0] ss:$12 sps:$4 sm:$0xff]   ;;  %v1809_v26 = vld [vmem:[#allocation2 + $0x38] ss:$12 sps:$4 sm:$0xff]  }
 0x118   :  { %1906 = vtanh.f32 %v446_v22  ;;  %v450_v51 = vadd.f32 %v449_v23, %v2175_v60  ;;  %1210 = vmatpush1.bf16.msra.mxu1 %v1789_v31  ;;  %v1793_v22 = vld [vmem:[#allocation2 + $0x98] ss:$12 sps:$4 sm:$0xff]   ;;  %v1797_v23 = vld [vmem:[#allocation2 + $0x80] ss:$12 sps:$4 sm:$0xff]   ;;  %v1802_v21 = vld [vmem:[#allocation2 + $0x48] ss:$12 sps:$4 sm:$0xff]  }
 0x119   :  { %v451_v27 = vpop.f32.mrf.mxu0  ;;  %1908 = vtanh.f32 %v434_v25  ;;  %v1897_v37 = vpop.eup %1896  ;;  %v803_v17 = vadd.s32 128, %v802_v14  ;;  %vm805_vm8 = vcmp.ge.s32.totalorder %v802_v14, %v804_v15  ;;  %vm808_vm9 = vcmp.lt.s32.totalorder %v802_v14, %v807_v18  ;;  %1211 = vmatprep.subr.bf16.mxu1 %v1981_v1  ;;  %v1805_v25 = vld [vmem:[#allocation2 + $0x50] ss:$12 sps:$4 sm:$0xff]  }
 0x11a   :  { %v452_v36 = vadd.f32 %v451_v27, %v2149_v45  ;;  %1910 = vtanh.f32 %v440_v32  ;;  %vm2257_vm10 = vmand %vm805_vm8, %vm808_vm9  ;;  %v538_v27 = vld [vmem:[%s2488_s2 + $0x6] sm:$0x3] }
 0x11b   :  { %v453_v29 = vpop.f32.mrf.mxu0  ;;  %vm806_vm5 = vcmp.ge.s32.totalorder %v803_v17, %v804_v15  ;;  %vm809_vm6 = vcmp.lt.s32.totalorder %v803_v17, %v807_v18  ;;  %vm1600_vm11 = vmpackc.low %vm2257_vm10, %vm2257_vm10 }
 0x11c   :  { %1912 = vtanh.f32 %v452_v36  ;;  %v454_v56 = vadd.f32 %v453_v29, %v2175_v60  ;;  %vm811_vm7 = vmand %vm806_vm5, %vm809_vm6  ;;  %1212 = vmatpush1.bf16.msra.mxu1 %v1793_v22  ;;  %v1813_v29 = vld [vmem:[#allocation2 + $0x20] ss:$12 sps:$4 sm:$0xff]  }
 0x11d   :  { %v455_v34 = vpop.f32.mrf.mxu0  ;;  %v1899_v41 = vpop.eup %1898  ;;  %v813_v19 = vsel %vm811_vm7, 1.0, %v1979_v0  ;;  %1213 = vmatprep.subr.bf16.mxu1 %v1981_v1 }
 0x11e   :  { %741 = vmatmul.mubr.bf16.gmra.mxu1 %v506_v30  ;;  %v456_v39 = vadd.f32 %v455_v34, %v2149_v45  ;;  %v1901_v43 = vpop.eup %1900  ;;  %v511_v46 = vpack.c.bf16 %v1899_v41, %v1897_v37  ;;  %v815_v20 = vpack.c.bf16 %v813_v19, %v813_v19  ;;  %v2272_v30 = vrot.slane %v538_v27, %v2165_v54 }
 0x11f   :  { %1593 = vmatprep.mubr.msk.bf16.mxu1 %vm650_vm4, %v509_v28  ;;  %v459_v40 = vpop.f32.mrf.mxu0  ;;  %v508_v48 = vpack.c.bf16 %v1901_v43, %v1895_v35  ;;  %v1903_v50 = vpop.eup %1902  ;;  %v2275_v34 = vrot.slane %v538_v27, %v2137_v38 }
 0x120   :  { %1914 = vtanh.f32 %v456_v39  ;;  %v460_v62 = vadd.f32 %v459_v40, %v2175_v60  ;;  %1599 = vmatprep.mubr.msk.bf16.mxu0 %vm310_vm3, %v815_v20  ;;  %1214 = vmatpush1.bf16.msra.mxu1 %v1797_v23 }
 0x121   :  { %v461_v44 = vpop.f32.mrf.mxu0  ;;  %1916 = vtanh.f32 %v444_v42  ;;  %v1905_v52 = vpop.eup %1904  ;;  %1215 = vmatprep.subr.bf16.mxu1 %v1981_v1 }
 0x122   :  { %v462_v53 = vadd.f32 %v461_v44, %v2149_v45  ;;  %1918 = vtanh.f32 %v450_v51 }
 0x123   :  { %v463_v47 = vpop.f32.mrf.mxu0 }
 0x124   :  { %1920 = vtanh.f32 %v462_v53  ;;  %1216 = vmatpush1.bf16.msra.mxu1 %v1801_v24 }
 0x125   :  { %v464_v49 = vpop.f32.mrf.mxu0  ;;  %v1907_v55 = vpop.eup %1906  ;;  %1922 = vtanh.f32 %v454_v56  ;;  %1217 = vmatprep.subr.bf16.mxu1 %v1981_v1 }
 0x126   :  { %751 = vmatmul.mubr.bf16.gmra.mxu1 %v508_v48  ;;  %v1909_v57 = vpop.eup %1908  ;;  %v513_v58 = vpack.c.bf16 %v1907_v55, %v1905_v52  ;;  %1924 = vtanh.f32 %v460_v62 }
 0x127   :  { %1594 = vmatprep.mubr.msk.bf16.mxu1 %vm650_vm4, %v511_v46  ;;  %v510_v59 = vpack.c.bf16 %v1909_v57, %v1903_v50  ;;  %v1911_v61 = vpop.eup %1910 }
 0x128   :  { %1218 = vmatpush1.bf16.msra.mxu1 %v1805_v25 }
 0x129   :  { %v1913_v63 = vpop.eup %1912  ;;  %1219 = vmatprep.subr.bf16.mxu1 %v1981_v1 }
 0x12c   :  { %1220 = vmatpush1.bf16.msra.mxu1 %v1809_v26 }
 0x12d   :  { %v1915_v2 = vpop.eup %1914  ;;  %1221 = vmatprep.subr.bf16.mxu1 %v1981_v1 }
 0x12e   :  { %761 = vmatmul.mubr.bf16.gmra.mxu1 %v510_v59  ;;  %v1917_v3 = vpop.eup %1916  ;;  %v515_v45 = vpack.c.bf16 %v1915_v2, %v1913_v63 }
 0x12f   :  { %1595 = vmatprep.mubr.msk.bf16.mxu1 %vm650_vm4, %v513_v58  ;;  %v512_v4 = vpack.c.bf16 %v1917_v3, %v1911_v61  ;;  %v1919_v5 = vpop.eup %1918 }
 0x130   :  { %1222 = vmatpush1.bf16.msra.mxu1 %v1813_v29 }
 0x131   :  { %v1921_v6 = vpop.eup %1920  ;;  %1223 = vmatprep.subr.bf16.mxu1 %v1981_v1 }
 0x132   :  { %v1923_v7 = vpop.eup %1922  ;;  %v517_v8 = vpack.c.bf16 %v1921_v6, %v1921_v6 }
 0x133   :  { %v514_v9 = vpack.c.bf16 %v1923_v7, %v1919_v5  ;;  %v1925_v10 = vpop.eup %1924 }
 0x134   :  { %v516_v60 = vpack.c.bf16 %v1925_v10, %v1925_v10 }
 0x136   :  { %771 = vmatmul.mubr.bf16.gmra.mxu1 %v512_v4 }
 0x137   :  { %1596 = vmatprep.mubr.msk.bf16.mxu1 %vm650_vm4, %v515_v45 }
 0x13e   :  { %781 = vmatmul.mubr.bf16.gmra.mxu1 %v514_v9 }
 0x13f   :  { %1597 = vmatprep.mubr.msk.bf16.mxu1 %vm650_vm4, %v517_v8 }
 0x146   :  { %791 = vmatmul.mubr.bf16.gmra.mxu1 %v516_v60 }
 0x19e   :  { %v2252_v11 = vpop.f32.mrf.mxu1 }
 0x1a0   :  { %v1705_v12 = vpop.f32.mrf.mxu1 }
 0x1a2   :  { %v229_v13 = vpop.f32.mrf.mxu1 }
 0x1a4   :  { %v1706_v16 = vpop.f32.mrf.mxu1 }
 0x1c6   :  { %v712_v28 = vpop.f32.mrf.mxu1 }
 0x1c7   :  { %v2279_v36 = vadd.f32 %v712_v28, %v2272_v30 }
 0x1c8   :  { %v714_v32 = vpop.f32.mrf.mxu1 }
 0x1c9   :  { %v2285_v40 = vadd.f32 %v714_v32, %v2275_v34 }
 0x1ca   :  { %v716_v35 = vpop.f32.mrf.mxu1 }
 0x1cb   :  { %v2282_v37 = vadd.f32 %v716_v35, %v2272_v30 }
 0x1cc   :  { %v718_v39 = vpop.f32.mrf.mxu1 }
 0x1cd   :  { %v816_v41 = vpack.c.bf16 %v2282_v37, %v2279_v36  ;;  %v2290_v42 = vadd.f32 %v718_v39, %v2275_v34  ;;  %v1796_v36 = vld [vmem:[#allocation2 + $0x7c] ss:$12 sps:$4 sm:$0xff]   ;;  %v1794_v37 = vld [vmem:[#allocation2 + $0x78] ss:$12 sps:$4 sm:$0xff]  }
 0x1ce   :  { %v722_v43 = vpop.f32.mrf.mxu1 }
 0x1cf   :  { %v817_v44 = vpack.c.bf16 %v2290_v42, %v2285_v40  ;;  %v2295_v48 = vadd.f32 %v722_v43, %v2272_v30  ;;  %v1792_v40 = vld [vmem:[#allocation2 + $0x94] ss:$12 sps:$4 sm:$0xff]   ;;  %v1982_v42 = vmov 1.0|1.0  }
 0x1d0   :  { %v724_v46 = vpop.f32.mrf.mxu1 }
 0x1d1   :  { %v2301_v51 = vadd.f32 %v724_v46, %v2275_v34 }
 0x1d2   :  { %v726_v47 = vpop.f32.mrf.mxu1 }
 0x1d3   :  { %v2298_v49 = vadd.f32 %v726_v47, %v2272_v30 }
 0x1d4   :  { %v728_v50 = vpop.f32.mrf.mxu1 }
 0x1d5   :  { %v818_v52 = vpack.c.bf16 %v2298_v49, %v2295_v48  ;;  %v2306_v53 = vadd.f32 %v728_v50, %v2275_v34  ;;  %v1798_v48 = vld [vmem:[#allocation2 + $0x60] ss:$12 sps:$4 sm:$0xff]  }
 0x1d6   :  { %v2308_v55 = vpop.f32.mrf.mxu1  ;;  %v1804_v49 = vld [vmem:[#allocation2 + $0x4c] ss:$12 sps:$4 sm:$0xff]  }
 0x1d7   :  { %v819_v56 = vpack.c.bf16 %v2306_v53, %v2301_v51  ;;  %v1788_v51 = vld [vmem:[#allocation2 + $0xac] ss:$12 sps:$4 sm:$0xff]   ;;  %v1806_v53 = vld [vmem:[#allocation2 + $0x30] ss:$12 sps:$4 sm:$0xff]  }
 0x1d8   :  { %v2312_v57 = vpop.f32.mrf.mxu1 }
 0x1da   :  { %v2314_v58 = vpop.f32.mrf.mxu1 }
 0x1dc   :  { %v738_v59 = vpop.f32.mrf.mxu1 }
 0x1de   :  { %v742_v61 = vpop.f32.mrf.mxu1 }
 0x1e0   :  { %v744_v62 = vpop.f32.mrf.mxu1 }
 0x1e2   :  { %v746_v63 = vpop.f32.mrf.mxu1 }
 0x1e4   :  { %v748_v2 = vpop.f32.mrf.mxu1 }
 0x1e6   :  { %v752_v3 = vpop.f32.mrf.mxu1 }
 0x1e8   :  { %v754_v45 = vpop.f32.mrf.mxu1 }
 0x1ea   :  { %v756_v4 = vpop.f32.mrf.mxu1 }
 0x1ec   :  { %v758_v5 = vpop.f32.mrf.mxu1 }
 0x1ee   :  { %v762_v6 = vpop.f32.mrf.mxu1 }
 0x1f0   :  { %v764_v7 = vpop.f32.mrf.mxu1 }
 0x1f1   :  { %v765_v43 = vadd.f32 %v764_v7, %v2275_v34 }
 0x1f2   :  { %v766_v8 = vpop.f32.mrf.mxu1 }
 0x1f3   :  { %v767_v46 = vadd.f32 %v766_v8, %v2272_v30  ;;  %v745_v8 = vadd.f32 %v744_v62, %v2275_v34  ;;  %v733_v62 = vadd.f32 %v2308_v55, %v2272_v30 }
 0x1f4   :  { %v768_v9 = vpop.f32.mrf.mxu1 }
 0x1f5   :  { %v769_v29 = vadd.f32 %v768_v9, %v2275_v34  ;;  %v755_v9 = vadd.f32 %v754_v45, %v2275_v34  ;;  %v743_v45 = vadd.f32 %v742_v61, %v2272_v30  ;;  %v1810_v61 = vld [vmem:[#allocation2 + $0x18] ss:$12 sps:$4 sm:$0xff]  }
 0x1f6   :  { %v772_v10 = vpop.f32.mrf.mxu1 }
 0x1f7   :  { %v773_v35 = vadd.f32 %v772_v10, %v2272_v30  ;;  %v757_v10 = vadd.f32 %v756_v4, %v2272_v30  ;;  %v735_v4 = vadd.f32 %v2312_v57, %v2275_v34 }
 0x1f8   :  { %v774_v60 = vpop.f32.mrf.mxu1 }
 0x1f9   :  { %v775_v24 = vadd.f32 %v774_v60, %v2275_v34  ;;  %v759_v60 = vadd.f32 %v758_v5, %v2275_v34  ;;  %v747_v5 = vadd.f32 %v746_v63, %v2272_v30 }
 0x1fa   :  { %v776_v12 = vpop.f32.mrf.mxu1 }
 0x1fb   :  { %v777_v26 = vadd.f32 %v776_v12, %v2272_v30  ;;  %v827_v12 = vpack.c.bf16 %v769_v29, %v765_v43  ;;  %v825_v7 = vpack.c.bf16 %v759_v60, %v755_v9  ;;  %v1828_v29 = vld [vmem:[%s2491_s5 + $0xe8] ss:$16 sps:$4 sm:$0xff]  }
 0x1fc   :  { %v778_v13 = vpop.f32.mrf.mxu1 }
 0x1fd   :  { %v779_v19 = vadd.f32 %v778_v13, %v2275_v34  ;;  %v828_v47 = vpack.c.bf16 %v777_v26, %v773_v35  ;;  %v763_v13 = vadd.f32 %v762_v6, %v2272_v30  ;;  %v739_v6 = vadd.f32 %v738_v59, %v2275_v34  ;;  %v1824_v26 = vld [vmem:[#allocation2 + $0xc4] ss:$12 sps:$4 sm:$0xff]  }
 0x1fe   :  { %v782_v14 = vpop.f32.mrf.mxu1 }
 0x1ff   :  { %v783_v22 = vadd.f32 %v782_v14, %v2272_v30  ;;  %v829_v32 = vpack.c.bf16 %v779_v19, %v775_v24  ;;  %v826_v14 = vpack.c.bf16 %v767_v46, %v763_v13  ;;  %v821_v19 = vpack.c.bf16 %v739_v6, %v735_v4  ;;  %v1818_v24 = vld [vmem:[#allocation2 + $0xd8] ss:$12 sps:$4 sm:$0xff]   ;;  %v1833_v4 = vld [vmem:[%s2491_s5 + $0xcc] ss:$16 sps:$4 sm:$0xff]  }
 0x200   :  { %v784_v15 = vpop.f32.mrf.mxu1 }
 0x201   :  { %v785_v20 = vadd.f32 %v784_v15, %v2275_v34  ;;  %v749_v15 = vadd.f32 %v748_v2, %v2275_v34  ;;  %v737_v2 = vadd.f32 %v2314_v58, %v2272_v30 }
 0x202   :  { %v786_v16 = vpop.f32.mrf.mxu1 }
 0x203   :  { %v787_v17 = vadd.f32 %v786_v16, %v2272_v30  ;;  %v753_v16 = vadd.f32 %v752_v3, %v2272_v30  ;;  %v822_v3 = vpack.c.bf16 %v747_v5, %v743_v45  ;;  %v820_v63 = vpack.c.bf16 %v737_v2, %v733_v62  ;;  %v1826_v5 = vld [vmem:[%s2491_s5 + $0xe4] ss:$16 sps:$4 sm:$0xff]   ;;  %v1836_v2 = vld [vmem:[%s2491_s5 + $0xa8] ss:$16 sps:$4 sm:$0xff]  }
 0x204   :  { %v788_v18 = vpop.f32.mrf.mxu1  ;;  %v1830_v45 = vld [vmem:[%s2491_s5 + $0xc4] ss:$16 sps:$4 sm:$0xff]  }
 0x205   :  { %v789_v31 = vadd.f32 %v788_v18, %v2275_v34  ;;  %v830_v27 = vpack.c.bf16 %v787_v17, %v783_v22  ;;  %v824_v17 = vpack.c.bf16 %v757_v10, %v753_v16  ;;  %v823_v18 = vpack.c.bf16 %v749_v15, %v745_v8  ;;  %v1817_v22 = vld [vmem:[#allocation2 + $0x8] ss:$12 sps:$4 sm:$0xff]  }
 0x206   :  { %v792_v23 = vpop.f32.mrf.mxu1  ;;  %1224 = vmatpush1.bf16.msra.mxu1 %v1817_v22  ;;  %v1838_v62 = vld [vmem:[%s2491_s5 + $0x84] ss:$16 sps:$4 sm:$0xff]  }
 0x207   :  { %v831_v25 = vpack.c.bf16 %v789_v31, %v785_v20  ;;  %v793_v59 = vadd.f32 %v792_v23, %v2272_v30  ;;  %v1816_v20 = vld [vmem:[#allocation2 + $0x4] ss:$12 sps:$4 sm:$0xff]   ;;  %v1814_v31 = vld [vmem:[#allocation2] ss:$12 sps:$4 sm:$0xff]   ;;  %v1820_v23 = vld [vmem:[#allocation2 + $0xdc] ss:$12 sps:$4 sm:$0xff]   ;;  %1237 = vmatprep.subr.bf16.mxu1 %v1981_v1 }
 0x208   :  { %v794_v28 = vpop.f32.mrf.mxu1 }
 0x209   :  { %843 = vmatprep.subr.bf16.mxu0 %v831_v25  ;;  %v795_v57 = vadd.f32 %v794_v28, %v2275_v34  ;;  %v832_v55 = vpack.c.bf16 %v793_v59, %v793_v59  ;;  %v1786_v34 = vld [vmem:[#allocation2 + $0xa8] ss:$12 sps:$4 sm:$0xff]   ;;  %v1821_v25 = vld [vmem:[#allocation2 + $0xe0] ss:$12 sps:$4 sm:$0xff]  }
 0x20a   :  { %844 = vmatpush1.bf16.msra.mxu0 %v830_v27  ;;  %v796_v39 = vpop.f32.mrf.mxu1  ;;  %1238 = vmatpush2.bf16.msra.mxu1 %v1821_v25  ;;  %v1822_v27 = vld [vmem:[#allocation2 + $0xc0] ss:$12 sps:$4 sm:$0xff]   ;;  %v1825_v28 = vld [vmem:[#allocation2 + $0xc8] ss:$12 sps:$4 sm:$0xff]  }
 0x20b   :  { %845 = vmatprep.subr.bf16.mxu0 %v829_v32  ;;  %v833_v58 = vpack.c.bf16 %v795_v57, %v795_v57  ;;  %v838_v30 = vsel %vm338_vm1, %v832_v55, 0  ;;  %1239 = vmatprep.subr.bf16.mxu1 %v1981_v1  ;;  %v902_v32 = vld [vmem:[%s2488_s2 + $0xa] sm:$0x3]  ;;  %v916_v39 = vld [vmem:[%s2488_s2 + $0xc] sm:$0x3] }
 0x20c   :  { %v797_v50 = vpop.f32.mrf.mxu1  ;;  %v907_v35 = vrot.slane %v902_v32, %v2165_v54  ;;  %v925_v9 = vrot.slane %v916_v39, %v2137_v38  ;;  %v1844_v59 = vld [vmem:[%s2491_s5 + $0x68] ss:$16 sps:$4 sm:$0xff]   ;;  %v1842_v57 = vld [vmem:[%s2491_s5 + $0x64] ss:$16 sps:$4 sm:$0xff]   ;;  %v1845_v55 = vld [vmem:[%s2491_s5 + $0x6c] ss:$16 sps:$4 sm:$0xff]  }
 0x20d   :  { %v921_v50 = vrot.slane %v916_v39, %v2165_v54 }
 0x20e   :  { %846 = vmatpush1.bf16.msra.mxu0 %v828_v47  ;;  %1240 = vmatpush2.bf16.msra.mxu1 %v1825_v28  ;;  %v911_v47 = vrot.slane %v902_v32, %v2137_v38 }
 0x20f   :  { %847 = vmatprep.subr.bf16.mxu0 %v827_v12  ;;  %1707 = vmatprep.subr.bf16.mxu1 %v1979_v0 }
 0x212   :  { %848 = vmatpush1.bf16.msra.mxu0 %v826_v14 }
 0x213   :  { %849 = vmatprep.subr.bf16.mxu0 %v825_v7 }
 0x216   :  { %850 = vmatpush1.bf16.msra.mxu0 %v824_v17  ;;  %v1829_v17 = vld [vmem:[%s2491_s5 + $0xec] ss:$16 sps:$4 sm:$0xff]  }
 0x217   :  { %851 = vmatprep.subr.bf16.mxu0 %v823_v18  ;;  %v1832_v18 = vld [vmem:[%s2491_s5 + $0xc8] ss:$16 sps:$4 sm:$0xff]  }
 0x21a   :  { %852 = vmatpush1.bf16.msra.mxu0 %v822_v3  ;;  %v1834_v3 = vld [vmem:[%s2491_s5 + $0xa4] ss:$16 sps:$4 sm:$0xff]  }
 0x21b   :  { %853 = vmatprep.subr.bf16.mxu0 %v821_v19  ;;  %v1837_v19 = vld [vmem:[%s2491_s5 + $0xac] ss:$16 sps:$4 sm:$0xff]  }
 0x21e   :  { %854 = vmatpush1.bf16.msra.mxu0 %v820_v63  ;;  %v1841_v63 = vld [vmem:[%s2491_s5 + $0x8c] ss:$16 sps:$4 sm:$0xff]  }
 0x21f   :  { %855 = vmatprep.subr.bf16.mxu0 %v819_v56  ;;  %v1812_v56 = vld [vmem:[#allocation2 + $0x1c] ss:$12 sps:$4 sm:$0xff]  }
 0x222   :  { %856 = vmatpush1.bf16.msra.mxu0 %v818_v52  ;;  %v1808_v52 = vld [vmem:[#allocation2 + $0x34] ss:$12 sps:$4 sm:$0xff]  }
 0x223   :  { %857 = vmatprep.subr.bf16.mxu0 %v817_v44  ;;  %v1790_v44 = vld [vmem:[#allocation2 + $0x90] ss:$12 sps:$4 sm:$0xff]  }
 0x226   :  { %858 = vmatpush1.bf16.msra.mxu0 %v816_v41  ;;  %v1800_v41 = vld [vmem:[#allocation2 + $0x64] ss:$12 sps:$4 sm:$0xff]  }
 0x227   :  { %1598 = vmatprep.subr.msk.bf16.mxu0 %vm338_vm1, %v833_v58  ;;  %v1848_v58 = vld [vmem:[%s2491_s5 + $0x48] ss:$16 sps:$4 sm:$0xff]  }
 0x22a   :  { %874 = vmatpush2.bf16.msra.mxu0 %v838_v30  ;;  %v1846_v30 = vld [vmem:[%s2491_s5 + $0x44] ss:$16 sps:$4 sm:$0xff]  }
 0x22b   :  { %1168 = vmatprep.subr.bf16.mxu0 %v1788_v51  ;;  %v1539_v51 = vld [vmem:[%s2488_s2 + $0x3] ss:$0 sm:$0xff] }
 0x22d   :  { %1601 = vmatmul.mubr.msk.bf16.vlgmr.msra.gmra.mxu0 %vm1600_vm11, %v1982_v42  ;;  %v1852_v42 = vld [vmem:[%s2491_s5 + $0x28] ss:$16 sps:$4 sm:$0xff]  }
 0x22e   :  { %1169 = vmatpush1.bf16.msra.mxu0 %v1786_v34  ;;  %v1849_v34 = vld [vmem:[%s2491_s5 + $0x4c] ss:$16 sps:$4 sm:$0xff]  }
 0x22f   :  { %1170 = vmatprep.subr.bf16.mxu0 %v1792_v40  ;;  %v227_v40 = vadd.f32 %v1539_v51, %v2252_v11  ;;  %v1853_v11 = vld [vmem:[%s2491_s5 + $0x2c] ss:$16 sps:$4 sm:$0xff]  }
 0x232   :  { %1171 = vmatpush1.bf16.msra.mxu0 %v1790_v44  ;;  %v1602_v44 = vld [vmem:[%s2488_s2 + $0x8] ss:$0 sm:$0xff] }
 0x233   :  { %1172 = vmatprep.subr.bf16.mxu0 %v1796_v36  ;;  %v1850_v36 = vld [vmem:[%s2491_s5 + $0x24] ss:$16 sps:$4 sm:$0xff]  }
 0x236   :  { %1173 = vmatpush1.bf16.msra.mxu0 %v1794_v37  ;;  %v893_v37 = vmul.f32 %v1602_v44, %v227_v40 }
 0x237   :  { %1174 = vmatprep.subr.bf16.mxu0 %v1800_v41  ;;  %v1856_v41 = vld [vmem:[%s2491_s5 + $0x8] ss:$16 sps:$4 sm:$0xff]  }
 0x23a   :  { %1175 = vmatpush1.bf16.msra.mxu0 %v1798_v48  ;;  %v1603_v48 = vld [vmem:[%s2488_s2 + $0x9] ss:$0 sm:$0xff] }
 0x23b   :  { %1176 = vmatprep.subr.bf16.mxu0 %v1804_v49  ;;  %v1854_v49 = vld [vmem:[%s2491_s5 + $0x4] ss:$16 sps:$4 sm:$0xff]  }
 0x23e   :  { %1177 = vmatpush1.bf16.msra.mxu0 %v1802_v21  ;;  %v1857_v21 = vld [vmem:[%s2491_s5 + $0xc] ss:$16 sps:$4 sm:$0xff]  }
 0x23f   :  { %1178 = vmatprep.subr.bf16.mxu0 %v1808_v52  ;;  %v901_v52 = vadd.f32 %v1603_v48, %v893_v37 }
 0x242   :  { %1179 = vmatpush1.bf16.msra.mxu0 %v1806_v53  ;;  %v930_v53 = vpack.c.bf16 %v901_v52, %v901_v52 }
 0x243   :  { %1180 = vmatprep.subr.bf16.mxu0 %v1812_v56 }
 0x246   :  { %1181 = vmatpush1.bf16.msra.mxu0 %v1810_v61 }
 0x247   :  { %1182 = vmatprep.subr.bf16.mxu0 %v1816_v20 }
 0x24a   :  { %1183 = vmatpush1.bf16.msra.mxu0 %v1814_v31 }
 0x24b   :  { %1196 = vmatprep.subr.bf16.mxu0 %v1820_v23 }
 0x24e   :  { %1197 = vmatpush2.bf16.msra.mxu0 %v1818_v24 }
 0x24f   :  { %1198 = vmatprep.subr.bf16.mxu0 %v1824_v26  ;;  %v1470_v26 = vsub.s32 2, %v2134_v33 }
 0x252   :  { %1199 = vmatpush2.bf16.msra.mxu0 %v1822_v27  ;;  %v1458_v27 = vld [vmem:[%s2488_s2 + $0xe] sm:$0x7] }
 0x253   :  { %1377 = vmatprep.subr.bf16.mxu0 %v1828_v29  ;;  %v1471_v28 = vrot.slane %v1458_v27, %v1470_v26 }
 0x2ed   :  { %v877_v43 = vpop.f32.mrf.mxu0 }
 0x2ee   :  { %v884_v46 = vmul.f32 0.05882353, %v877_v43  ;;  %v1467_v43 = vrot.slane %v1458_v27, %v2137_v38 }
 0x2ef   :  { %v879_v60 = vpop.f32.mrf.mxu0 }
 0x2f0   :  { %v914_v12 = vmul.f32 %v907_v35, %v884_v46  ;;  %v885_v13 = vmul.f32 0.05882353, %v879_v60 }
 0x2f1   :  { %v881_v10 = vpop.f32.mrf.mxu0 }
 0x2f2   :  { %v915_v14 = vmul.f32 %v911_v47, %v885_v13  ;;  %v928_v15 = vadd.f32 %v921_v50, %v914_v12 }
 0x2f3   :  { %v882_v7 = vpop.f32.mrf.mxu0 }
 0x2f4   :  { %v929_v16 = vadd.f32 %v925_v9, %v915_v14  ;;  %v963_v6 = vpack.c.bf16 %v928_v15, %v928_v15  ;;  %v1481_v15 = vld [vmem:[%s2488_s2 + $0x11] sm:$0x7] }
 0x2f5   :  { %v1486_v7 = vrot.slane %v1481_v15, %v2165_v54 }
 0x2f6   :  { %v964_v8 = vpack.c.bf16 %v929_v16, %v929_v16  ;;  %v1490_v16 = vrot.slane %v1481_v15, %v2137_v38 }
 0x2f8   :  { %1634 = vmatprep.mubr.msk.bf16.mxu0 %vm650_vm4, %v964_v8  ;;  %1635 = vmatprep.mubr.msk.bf16.mxu1 %vm650_vm4, %v964_v8 }
 0x2f9   :  { %1201 = vmatmul.mubr.bf16.vlgmr.msra.gmra.mxu0 %v963_v6  ;;  %1242 = vmatmul.mubr.bf16.vlgmr.msra.gmra.mxu1 %v963_v6 }
 0x2fa   :  { %1378 = vmatpush1.bf16.msra.mxu0 %v1826_v5  ;;  %1708 = vmatpush3.bf16.msra.mxu1 %v1829_v17  ;;  %v1494_v17 = vrot.slane %v1481_v15, %v1470_v26 }
 0x2fb   :  { %1379 = vmatprep.subr.bf16.mxu0 %v1832_v18  ;;  %1709 = vmatprep.subr.bf16.mxu1 %v1979_v0 }
 0x2fc   :  { %1409 = vmatprep.mubr.bf16.mxu0 %v1981_v1  ;;  %1723 = vmatprep.mubr.msk.bf16.mxu1 %vm1980_vm0, %v1979_v0  ;;  %v1840_v1 = vld [vmem:[%s2491_s5 + $0x88] ss:$16 sps:$4 sm:$0xff]  }
 0x2fe   :  { %1380 = vmatpush1.bf16.msra.mxu0 %v1830_v45  ;;  %1710 = vmatpush3.bf16.msra.mxu1 %v1833_v4 }
 0x2ff   :  { %1381 = vmatprep.subr.bf16.mxu0 %v1836_v2  ;;  %1711 = vmatprep.subr.bf16.mxu1 %v1979_v0 }
 0x302   :  { %1382 = vmatpush1.bf16.msra.mxu0 %v1834_v3  ;;  %1712 = vmatpush3.bf16.msra.mxu1 %v1837_v19  ;;  %v1660_v19 = vld [vmem:[%s2488_s2 + $0x14] ss:$0 sm:$0xff] }
 0x303   :  { %1383 = vmatprep.subr.bf16.mxu0 %v1840_v1  ;;  %1713 = vmatprep.subr.bf16.mxu1 %v1979_v0 }
 0x306   :  { %1384 = vmatpush1.bf16.msra.mxu0 %v1838_v62  ;;  %1714 = vmatpush3.bf16.msra.mxu1 %v1841_v63 }
 0x307   :  { %1385 = vmatprep.subr.bf16.mxu0 %v1844_v59  ;;  %1715 = vmatprep.subr.bf16.mxu1 %v1979_v0 }
 0x30a   :  { %1386 = vmatpush1.bf16.msra.mxu0 %v1842_v57  ;;  %1716 = vmatpush3.bf16.msra.mxu1 %v1845_v55 }
 0x30b   :  { %1387 = vmatprep.subr.bf16.mxu0 %v1848_v58  ;;  %1717 = vmatprep.subr.bf16.mxu1 %v1979_v0 }
 0x30e   :  { %1388 = vmatpush1.bf16.msra.mxu0 %v1846_v30  ;;  %1718 = vmatpush3.bf16.msra.mxu1 %v1849_v34 }
 0x30f   :  { %1389 = vmatprep.subr.bf16.mxu0 %v1852_v42  ;;  %1719 = vmatprep.subr.bf16.mxu1 %v1979_v0 }
 0x312   :  { %1390 = vmatpush1.bf16.msra.mxu0 %v1850_v36  ;;  %1720 = vmatpush3.bf16.msra.mxu1 %v1853_v11 }
 0x313   :  { %1391 = vmatprep.subr.bf16.mxu0 %v1856_v41  ;;  %1721 = vmatprep.subr.bf16.mxu1 %v1979_v0  ;;  %v1463_v0 = vrot.slane %v1458_v27, %v2165_v54 }
 0x316   :  { %1392 = vmatpush1.bf16.msra.mxu0 %v1854_v49  ;;  %1722 = vmatpush3.bf16.msra.mxu1 %v1857_v21 }
 0x319   :  { %1410 = vmatmul.mubr.bf16.vlgmr.msra.gmra.mxu0 %v930_v53  ;;  %1724 = vmatmul.mubr.bf16.vlgmr.msra.gmra.mxu1 %v930_v53 }
 0x3b9   :  { %v1202_v56 = vpop.f32.mrf.mxu0  ;;  %v1243_v61 = vpop.f32.mrf.mxu1 }
 0x3bb   :  { %v1204_v20 = vpop.f32.mrf.mxu0  ;;  %v1245_v31 = vpop.f32.mrf.mxu1 }
 0x3bd   :  { %v1206_v22 = vpop.f32.mrf.mxu0  ;;  %v1246_v23 = vpop.f32.mrf.mxu1 }
 0x3bf   :  { %v1207_v24 = vpop.f32.mrf.mxu0  ;;  %v1247_v25 = vpop.f32.mrf.mxu1 }
 0x3d9   :  { %v1411_v29 = vpop.f32.mrf.mxu0  ;;  %v1452_v32 = vpop.f32.mrf.mxu1 }
 0x3da   :  { %v1412_v35 = vadd.f32 %v1411_v29, %v1202_v56  ;;  %v1453_v39 = vadd.f32 %v1452_v32, %v1243_v61 }
 0x3db   :  { %v1413_v46 = vpop.f32.mrf.mxu0  ;;  %v1725_v47 = vpop.f32.mrf.mxu1 }
 0x3dc   :  { %v1475_v50 = vadd.f32 %v1463_v0, %v1412_v35  ;;  %v1477_v60 = vadd.f32 %v1471_v28, %v1453_v39  ;;  %v1414_v12 = vadd.f32 %v1413_v46, %v1204_v20 }
 0x3dd   :  { %v1415_v13 = vpop.f32.mrf.mxu0  ;;  %v1455_v33 = vpop.f32.mrf.mxu1 }
 0x3de   :  { %1926 = vtanh.f32 %v1475_v50  ;;  %v1476_v9 = vadd.f32 %v1467_v43, %v1414_v12 }
 0x3df   :  { %1928 = vtanh.f32 %v1477_v60  ;;  %v1416_v10 = vpop.f32.mrf.mxu0  ;;  %v1726_v14 = vpop.f32.mrf.mxu1 }
 0x3e0   :  { %1930 = vtanh.f32 %v1476_v9 }
 0x3eb   :  { %v1927_v8 = vpop.eup %1926 }
 0x3ec   :  { %v1929_v5 = vpop.eup %1928  ;;  %v1498_v18 = vmul.f32 %v1927_v8, %v1486_v7 }
 0x3ed   :  { %v1931_v6 = vpop.eup %1930  ;;  %v1500_v4 = vmul.f32 %v1929_v5, %v1494_v17 }
 0x3ee   :  { %v1499_v45 = vmul.f32 %v1931_v6, %v1490_v16 }
 0x3f0   :  { %v1501_v2 = vadd.f32 %v1499_v45, %v1498_v18 }
 0x3f2   :  { %v1502_v3 = vadd.f32 %v1501_v2, %v1500_v4 }
 0x3f4   :  { %1503 = vadd.xlane.f32.xlu0 %v1502_v3 }
 0x47d   :  { %v1504_v1 = vpop.xlane.xlu0 %1503 }
 0x47e   :  { %v1512_v62 = vadd.f32 %v1660_v19, %v1504_v1 }
 0x480   :  { %1515 = vperm.xlu0 %1735, %v1512_v62  }
 0x4fb   :  { %v1516_v38 = vpop.permute.xlu0 %1515 }
 0x4fc   :  { %1518 = vst [vmem:[#allocation5] sm:$0xff] %v1516_v38 }
 0x4fd   :  { %1963 = shalt.err (!%p1960_p9)
}
 0x4fe   :  { %1528 = dma.vmem_to_hbm [thread:$0]  %s1526_s22, 128, %s2493_s7, [#allocation4]  }
 0x4ff   :  { %1974 = dma.done.wait [#allocation4], 128  }
 0x500   :  { %1975 = vsyncadd [#allocation4], 4294967168 }
 0x501   :  { %1532 = vsyncpa [#allocation3], 1 }
 0x502   :  { %1533 = vsyncpa [#allocation4], 1 }

</bundles_post_ra>
